<compile_context>
chip_gen: v7x
topology: tpu7x:2x2x1
jax: 0.10.0
libtpu: 0.0.40
codegen_flags: <defaults>
</compile_context>

<pallas_src>
import jax
import jax.numpy as jnp
from jax.experimental import pallas as pl
from jax.experimental.pallas import tpu as pltpu

INPUT_DIM = 15
HIDDEN_DIM = 128
HALF_DIM = HIDDEN_DIM // 2
NUM_ACTIONS = 5
NUM_STRATEGIES = 4

LANES = 128
X_COLS = 16          # state padded 15 -> 16 columns (last column zero)
ACTION_LANE = 64     # action probabilities live in lanes 64:69 of the output
NEG_PAD = -1e30      # bias padding so padded softmax lanes get probability 0

# --- packed parameter slab layout (rows x 128 lanes, bf16) -------------------
# (x@w1 and x@u1s are fused into a separate (16, 256) slab, see pack_params.)
OFF_U1G = 0     # 128 rows : tactical L1, strategy part (4->128), rows >=4 zero
OFF_W2 = 128    # 128 rows : strategic L2  (128->64), cols >=64 zero
OFF_W3 = 256    # 128 rows : strategic head (64->4), rows >=64 / cols >=4 zero
OFF_U2 = 384    # 128 rows : tactical L2 (128->64), cols >=64 zero
OFF_U3 = 512    # 128 rows : tactical head (64->5) shifted to cols 64:69
OFF_B = 640     # 16 rows  : bias rows [b1, b2, b3, c1, c2, c3, 0...]
SLAB_ROWS = 656


def _round_up(x, m):
    return ((x + m - 1) // m) * m


def _cdiv(a, b):
    return -(-a // b)


def _softmax_padded(logits):
    """Softmax over 128 lanes; padded lanes carry -1e30 so they map to 0."""
    m = jnp.max(logits, axis=-1, keepdims=True)
    e = jnp.exp(logits - m)
    s = jnp.sum(e, axis=-1, keepdims=True)
    return e * pl.reciprocal(s, approx=True)


def policy_kernel(x_ref, l1_ref, slab_ref, out_ref):
    x = x_ref[...]                                           # (TB, 16) bf16

    u1g = slab_ref[pl.ds(OFF_U1G, 128), :]
    w2 = slab_ref[pl.ds(OFF_W2, 128), :]
    w3 = slab_ref[pl.ds(OFF_W3, 128), :]
    u2 = slab_ref[pl.ds(OFF_U2, 128), :]
    u3 = slab_ref[pl.ds(OFF_U3, 128), :]
    # individual bf16 bias rows; the f32 add promotes (no 16x128 f32 temp)
    b1 = slab_ref[OFF_B + 0]
    b2 = slab_ref[OFF_B + 1]
    b3 = slab_ref[OFF_B + 2]
    c1 = slab_ref[OFF_B + 3]
    c2 = slab_ref[OFF_B + 4]
    c3 = slab_ref[OFF_B + 5]

    # fused layer 1: x @ [w1 | u1s] -> (TB, 256); one 256-wide MXU pass
    h0 = jnp.dot(x, l1_ref[...], preferred_element_type=jnp.float32)
    h_strat0 = h0[:, 0:LANES]                 # strategic L1 pre-bias
    t_state0 = h0[:, LANES:2 * LANES]         # tactical L1, state contribution

    # --- strategic branch: Linear-ReLU-Linear-ReLU-Linear-Softmax ------------
    h = jnp.maximum(h_strat0 + b1, 0.0)
    h = jnp.dot(h.astype(jnp.bfloat16), w2, preferred_element_type=jnp.float32) + b2
    h = jnp.maximum(h, 0.0)                                  # lanes >=64 are 0
    s_logits = jnp.dot(h.astype(jnp.bfloat16), w3,
                       preferred_element_type=jnp.float32) + b3
    strategy = _softmax_padded(s_logits)      # (TB,128); probs on lanes 0:4

    # --- tactical branch on concat([state, strategy]) via split matmul -------
    t = (t_state0
         + jnp.dot(strategy.astype(jnp.bfloat16), u1g,
                   preferred_element_type=jnp.float32)
         + c1)
    t = jnp.maximum(t, 0.0)
    t = jnp.dot(t.astype(jnp.bfloat16), u2, preferred_element_type=jnp.float32) + c2
    t = jnp.maximum(t, 0.0)
    a_logits = jnp.dot(t.astype(jnp.bfloat16), u3,
                       preferred_element_type=jnp.float32) + c3
    action = _softmax_padded(a_logits)        # (TB,128); probs on lanes 64:69

    # nonzero lanes of the two heads are disjoint -> single lane-dense store
    out_ref[...] = (strategy + action).astype(jnp.bfloat16)


# --- parameter construction / packing ----------------------------------------
def init_params(key, input_dim=INPUT_DIM, hidden_dim=HIDDEN_DIM,
                num_actions=NUM_ACTIONS):
    """PyTorch-style init: U(-1/sqrt(fan_in), 1/sqrt(fan_in)).
    Weights stored as (in, out); biases as (out,)."""
    half = hidden_dim // 2

    def linear(k, fan_in, fan_out):
        kw, kb = jax.random.split(k)
        bound = 1.0 / jnp.sqrt(float(fan_in))
        w = jax.random.uniform(kw, (fan_in, fan_out), jnp.float32, -bound, bound)
        b = jax.random.uniform(kb, (fan_out,), jnp.float32, -bound, bound)
        return w, b

    keys = jax.random.split(key, 6)
    w1, b1 = linear(keys[0], input_dim, hidden_dim)
    w2, b2 = linear(keys[1], hidden_dim, half)
    w3, b3 = linear(keys[2], half, NUM_STRATEGIES)
    u1, c1 = linear(keys[3], input_dim + NUM_STRATEGIES, hidden_dim)
    u2, c2 = linear(keys[4], hidden_dim, half)
    u3, c3 = linear(keys[5], half, num_actions)
    return dict(w1=w1, b1=b1, w2=w2, b2=b2, w3=w3, b3=b3,
                u1s=u1[:input_dim], u1g=u1[input_dim:], c1=c1,
                u2=u2, c2=c2, u3=u3, c3=c3)


def pack_params(p):
    """Pack weights into a (16,256) fused-L1 slab + a (656,128) main slab (bf16)."""
    w_l1 = jnp.zeros((16, 2 * LANES), jnp.float32)
    w_l1 = w_l1.at[:INPUT_DIM, :HIDDEN_DIM].set(p["w1"])
    w_l1 = w_l1.at[:INPUT_DIM, LANES:LANES + HIDDEN_DIM].set(p["u1s"])

    slab = jnp.zeros((SLAB_ROWS, LANES), jnp.float32)
    slab = slab.at[OFF_U1G:OFF_U1G + NUM_STRATEGIES, :HIDDEN_DIM].set(p["u1g"])
    slab = slab.at[OFF_W2:OFF_W2 + HIDDEN_DIM, :HALF_DIM].set(p["w2"])
    slab = slab.at[OFF_W3:OFF_W3 + HALF_DIM, :NUM_STRATEGIES].set(p["w3"])
    slab = slab.at[OFF_U2:OFF_U2 + HIDDEN_DIM, :HALF_DIM].set(p["u2"])
    slab = slab.at[OFF_U3:OFF_U3 + HALF_DIM,
                   ACTION_LANE:ACTION_LANE + NUM_ACTIONS].set(p["u3"])

    bias = jnp.zeros((16, LANES), jnp.float32)
    bias = bias.at[0, :HIDDEN_DIM].set(p["b1"])
    bias = bias.at[1, :HALF_DIM].set(p["b2"])
    bias = bias.at[2, :].set(NEG_PAD).at[2, :NUM_STRATEGIES].set(p["b3"])
    bias = bias.at[3, :HIDDEN_DIM].set(p["c1"])
    bias = bias.at[4, :HALF_DIM].set(p["c2"])
    bias = bias.at[5, :].set(NEG_PAD).at[
        5, ACTION_LANE:ACTION_LANE + NUM_ACTIONS].set(p["c3"])
    slab = slab.at[OFF_B:OFF_B + 16, :].set(bias)
    return w_l1.astype(jnp.bfloat16), slab.astype(jnp.bfloat16)


# --- wrapper ------------------------------------------------------------------
MAX_TILE_B = 1024   # ~5 MiB live footprint per tile: safe under every gen's
                    # default scoped-VMEM (16 MiB v5e / 32 MiB v6e,v7x).


def hierarchical_policy_forward(state, weights):
    """Mirrors HierarchicalPolicy.forward: returns (strategy, action_probs)."""
    w_l1, slab = weights
    state = jnp.asarray(state, jnp.float32)
    squeeze = state.ndim == 1
    if squeeze:
        state = state[None, :]
    B = state.shape[0]

    rb = _round_up(B, 8)
    if rb <= 256:
        tile_b = rb                               # tiny batch: single step
    else:
        # >= 2 grid steps so ("parallel",) can shard across both v7x TCs
        n_steps = max(2, _cdiv(rb, MAX_TILE_B))
        tile_b = _round_up(_cdiv(rb, n_steps), 8)
    b_pad = _round_up(B, tile_b)

    # bf16 lane-padded input (halves the input DMA, no in-kernel cast)
    x = jnp.zeros((b_pad, X_COLS), jnp.bfloat16)
    x = x.at[:B, :INPUT_DIM].set(state.astype(jnp.bfloat16))

    flops_per_row = 2 * (16 * 256 + 5 * 128 * 128)
    cost = pl.CostEstimate(
        flops=int(b_pad * flops_per_row),
        transcendentals=int(b_pad * 2 * (LANES + 1)),
        bytes_accessed=int(b_pad * (2 * X_COLS + 2 * LANES)
                           + 2 * (SLAB_ROWS * LANES + 16 * 2 * LANES)),
    )

    out = pl.pallas_call(
        policy_kernel,
        out_shape=jax.ShapeDtypeStruct((b_pad, LANES), jnp.bfloat16),
        grid=(b_pad // tile_b,),
        in_specs=[
            pl.BlockSpec((tile_b, X_COLS), lambda i: (i, 0)),
            pl.BlockSpec((16, 2 * LANES), lambda i: (0, 0)),       # resident
            pl.BlockSpec((SLAB_ROWS, LANES), lambda i: (0, 0)),    # resident
        ],
        out_specs=pl.BlockSpec((tile_b, LANES), lambda i: (i, 0)),
        compiler_params=pltpu.CompilerParams(
            dimension_semantics=("parallel",)),
        cost_estimate=cost,
    )(x, w_l1, slab)

    strategy = out[:B, :NUM_STRATEGIES].astype(jnp.float32)
    action_probs = out[:B, ACTION_LANE:ACTION_LANE + NUM_ACTIONS].astype(jnp.float32)
    if squeeze:
        return strategy[0], action_probs[0]
    return strategy, action_probs


# --- references ----------------------------------------------------------------
def _reference_like_kernel(state, w_l1, slab):
    """Pure-JAX reference reproducing the kernel's bf16 rounding and packing."""
    state = jnp.asarray(state, jnp.float32)
    if state.ndim == 1:
        state = state[None, :]
    B = state.shape[0]
    L1 = w_l1.astype(jnp.float32)
    s = slab.astype(jnp.float32)
    U1G = s[OFF_U1G:OFF_U1G + 128]
    W2 = s[OFF_W2:OFF_W2 + 128]
    W3 = s[OFF_W3:OFF_W3 + 128]
    U2 = s[OFF_U2:OFF_U2 + 128]
    U3 = s[OFF_U3:OFF_U3 + 128]
    BB = s[OFF_B:OFF_B + 16]
    b1, b2, b3, c1, c2, c3 = BB[0], BB[1], BB[2], BB[3], BB[4], BB[5]

    bf = lambda a: a.astype(jnp.bfloat16).astype(jnp.float32)
    x = jnp.zeros((B, X_COLS), jnp.float32).at[:, :INPUT_DIM].set(state)
    xb = bf(x)
    h0 = xb @ L1
    h = jnp.maximum(h0[:, :LANES] + b1, 0.0)
    h = jnp.maximum(bf(h) @ W2 + b2, 0.0)
    strat = jax.nn.softmax(bf(h) @ W3 + b3, axis=-1)
    t = jnp.maximum(h0[:, LANES:] + bf(strat) @ U1G + c1, 0.0)
    t = jnp.maximum(bf(t) @ U2 + c2, 0.0)
    act = jax.nn.softmax(bf(t) @ U3 + c3, axis=-1)
    packed = bf(strat + act)                     # mimic bf16 output store
    return (packed[:, :NUM_STRATEGIES],
            packed[:, ACTION_LANE:ACTION_LANE + NUM_ACTIONS])


def _reference_f32(state, p):
    """Full-precision semantic reference (matches the PyTorch module math)."""
    x = jnp.asarray(state, jnp.float32)
    if x.ndim == 1:
        x = x[None, :]
    h = jax.nn.relu(x @ p["w1"] + p["b1"])
    h = jax.nn.relu(h @ p["w2"] + p["b2"])
    strat = jax.nn.softmax(h @ p["w3"] + p["b3"], axis=-1)
    comb = jnp.concatenate([x, strat], axis=-1)
    u1 = jnp.concatenate([p["u1s"], p["u1g"]], axis=0)
    t = jax.nn.relu(comb @ u1 + p["c1"])
    t = jax.nn.relu(t @ p["u2"] + p["c2"])
    act = jax.nn.softmax(t @ p["u3"] + p["c3"], axis=-1)
    return strat, act


if __name__ == "__main__":
    key = jax.random.PRNGKey(0)
    k_params, k_state = jax.random.split(key)
    params = init_params(k_params)
    weights = pack_params(params)

    B = 8
    state = jax.random.normal(k_state, (B, INPUT_DIM), jnp.float32)

    strategy, action_probs = hierarchical_policy_forward(state, weights)
    strategy = jax.block_until_ready(strategy)
    action_probs = jax.block_until_ready(action_probs)

    assert strategy.shape == (B, NUM_STRATEGIES)
    assert action_probs.shape == (B, NUM_ACTIONS)

    # numerics-matched reference (bf16 operands/output, exact softmax)
    ref_s, ref_a = _reference_like_kernel(state, *weights)
    assert jnp.allclose(strategy, ref_s, atol=1e-2, rtol=1e-2)
    assert jnp.allclose(action_probs, ref_a, atol=1e-2, rtol=1e-2)

    # full-f32 semantic reference: loose check (bf16 weight/output rounding)
    f32_s, f32_a = _reference_f32(state, params)
    assert jnp.allclose(strategy, f32_s, atol=3e-2)
    assert jnp.allclose(action_probs, f32_a, atol=3e-2)

    # probabilities ~sum to 1 (approx reciprocal + bf16 output rounding)
    assert jnp.allclose(jnp.sum(strategy, axis=-1), 1.0, atol=1e-2)
    assert jnp.allclose(jnp.sum(action_probs, axis=-1), 1.0, atol=1e-2)

    # 1-D input path (unsqueeze handling like the PyTorch module)
    s1, a1 = hierarchical_policy_forward(state[0], weights)
    s1 = jax.block_until_ready(s1)
    assert s1.shape == (NUM_STRATEGIES,) and a1.shape == (NUM_ACTIONS,)
    assert jnp.allclose(s1, strategy[0], atol=1e-2)
    assert jnp.allclose(a1, action_probs[0], atol=1e-2)

    print("KERNEL_OK")
</pallas_src>

<mosaic_0001>
module attributes {stable_mosaic.version = 11 : i64} {
  func.func @policy_kernel(%arg0: i32, %arg1: memref<8x16xbf16, #tpu.memory_space<vmem>>, %arg2: memref<16x256xbf16, #tpu.memory_space<vmem>>, %arg3: memref<656x128xbf16, #tpu.memory_space<vmem>>, %arg4: memref<8x128xbf16, #tpu.memory_space<vmem>>) attributes {dimension_semantics = [#tpu.dimension_semantics<parallel>], iteration_bounds = array<i64: 1>, scalar_prefetch = 0 : i64, scratch_operands = 0 : i64, tpu.core_type = #tpu.core_type<tc>, window_params = [{transform_indices = @transform_0, window_bounds = array<i64: 8, 16>}, {pipeline_mode = #tpu.pipeline_mode<synchronous>, transform_indices = @transform_1, window_bounds = array<i64: 16, 256>}, {pipeline_mode = #tpu.pipeline_mode<synchronous>, transform_indices = @transform_2, window_bounds = array<i64: 656, 128>}, {transform_indices = @transform_3, window_bounds = array<i64: 8, 128>}]} {
    %c0 = arith.constant 0 : index
    %c0_0 = arith.constant 0 : index
    %0 = vector.load %arg1[%c0, %c0_0] : memref<8x16xbf16, #tpu.memory_space<vmem>>, vector<8x16xbf16>
    %c0_1 = arith.constant 0 : index
    %c0_2 = arith.constant 0 : index
    %1 = vector.load %arg3[%c0_1, %c0_2] : memref<656x128xbf16, #tpu.memory_space<vmem>>, vector<128x128xbf16>
    %c128 = arith.constant 128 : index
    %c0_3 = arith.constant 0 : index
    %2 = vector.load %arg3[%c128, %c0_3] : memref<656x128xbf16, #tpu.memory_space<vmem>>, vector<128x128xbf16>
    %c256 = arith.constant 256 : index
    %c0_4 = arith.constant 0 : index
    %3 = vector.load %arg3[%c256, %c0_4] : memref<656x128xbf16, #tpu.memory_space<vmem>>, vector<128x128xbf16>
    %c384 = arith.constant 384 : index
    %c0_5 = arith.constant 0 : index
    %4 = vector.load %arg3[%c384, %c0_5] : memref<656x128xbf16, #tpu.memory_space<vmem>>, vector<128x128xbf16>
    %c512 = arith.constant 512 : index
    %c0_6 = arith.constant 0 : index
    %5 = vector.load %arg3[%c512, %c0_6] : memref<656x128xbf16, #tpu.memory_space<vmem>>, vector<128x128xbf16>
    %c640 = arith.constant 640 : index
    %c0_7 = arith.constant 0 : index
    %6 = vector.load %arg3[%c640, %c0_7] : memref<656x128xbf16, #tpu.memory_space<vmem>>, vector<1x128xbf16>
    %7 = vector.shape_cast %6 : vector<1x128xbf16> to vector<128xbf16>
    %c641 = arith.constant 641 : index
    %c0_8 = arith.constant 0 : index
    %8 = vector.load %arg3[%c641, %c0_8] : memref<656x128xbf16, #tpu.memory_space<vmem>>, vector<1x128xbf16>
    %9 = vector.shape_cast %8 : vector<1x128xbf16> to vector<128xbf16>
    %c642 = arith.constant 642 : index
    %c0_9 = arith.constant 0 : index
    %10 = vector.load %arg3[%c642, %c0_9] : memref<656x128xbf16, #tpu.memory_space<vmem>>, vector<1x128xbf16>
    %11 = vector.shape_cast %10 : vector<1x128xbf16> to vector<128xbf16>
    %c643 = arith.constant 643 : index
    %c0_10 = arith.constant 0 : index
    %12 = vector.load %arg3[%c643, %c0_10] : memref<656x128xbf16, #tpu.memory_space<vmem>>, vector<1x128xbf16>
    %13 = vector.shape_cast %12 : vector<1x128xbf16> to vector<128xbf16>
    %c644 = arith.constant 644 : index
    %c0_11 = arith.constant 0 : index
    %14 = vector.load %arg3[%c644, %c0_11] : memref<656x128xbf16, #tpu.memory_space<vmem>>, vector<1x128xbf16>
    %15 = vector.shape_cast %14 : vector<1x128xbf16> to vector<128xbf16>
    %c645 = arith.constant 645 : index
    %c0_12 = arith.constant 0 : index
    %16 = vector.load %arg3[%c645, %c0_12] : memref<656x128xbf16, #tpu.memory_space<vmem>>, vector<1x128xbf16>
    %17 = vector.shape_cast %16 : vector<1x128xbf16> to vector<128xbf16>
    %c0_13 = arith.constant 0 : index
    %c0_14 = arith.constant 0 : index
    %18 = vector.load %arg2[%c0_13, %c0_14] : memref<16x256xbf16, #tpu.memory_space<vmem>>, vector<16x256xbf16>
    %cst = arith.constant dense<0.000000e+00> : vector<8x256xf32>
    %19 = tpu.matmul %0, %18, %cst {dimension_numbers = #tpu.dot_dimension_numbers<[1], [0], [0], [1], [0, 0, 1, 1], [], []>} : vector<8x16xbf16>, vector<16x256xbf16>, vector<8x256xf32> -> vector<8x256xf32>
    %20 = vector.extract_strided_slice %19 {offsets = [0, 0], sizes = [8, 128], strides = [1, 1]} : vector<8x256xf32> to vector<8x128xf32>
    %21 = vector.extract_strided_slice %19 {offsets = [0, 128], sizes = [8, 128], strides = [1, 1]} : vector<8x256xf32> to vector<8x128xf32>
    %22 = arith.extf %7 : vector<128xbf16> to vector<128xf32>
    %23 = vector.shape_cast %22 : vector<128xf32> to vector<1x128xf32>
    %24 = vector.broadcast %23 : vector<1x128xf32> to vector<8x128xf32>
    %25 = arith.addf %20, %24 : vector<8x128xf32>
    %cst_15 = arith.constant 0.000000e+00 : f32
    %26 = vector.broadcast %cst_15 : f32 to vector<8x128xf32>
    %27 = arith.maximumf %25, %26 : vector<8x128xf32>
    %28 = arith.truncf %27 : vector<8x128xf32> to vector<8x128xbf16>
    %cst_16 = arith.constant dense<0.000000e+00> : vector<8x128xf32>
    %29 = tpu.matmul %28, %2, %cst_16 {dimension_numbers = #tpu.dot_dimension_numbers<[1], [0], [0], [1], [0, 0, 1, 1], [], []>} : vector<8x128xbf16>, vector<128x128xbf16>, vector<8x128xf32> -> vector<8x128xf32>
    %30 = arith.extf %9 : vector<128xbf16> to vector<128xf32>
    %31 = vector.shape_cast %30 : vector<128xf32> to vector<1x128xf32>
    %32 = vector.broadcast %31 : vector<1x128xf32> to vector<8x128xf32>
    %33 = arith.addf %29, %32 : vector<8x128xf32>
    %cst_17 = arith.constant 0.000000e+00 : f32
    %34 = vector.broadcast %cst_17 : f32 to vector<8x128xf32>
    %35 = arith.maximumf %33, %34 : vector<8x128xf32>
    %36 = arith.truncf %35 : vector<8x128xf32> to vector<8x128xbf16>
    %cst_18 = arith.constant dense<0.000000e+00> : vector<8x128xf32>
    %37 = tpu.matmul %36, %3, %cst_18 {dimension_numbers = #tpu.dot_dimension_numbers<[1], [0], [0], [1], [0, 0, 1, 1], [], []>} : vector<8x128xbf16>, vector<128x128xbf16>, vector<8x128xf32> -> vector<8x128xf32>
    %38 = arith.extf %11 : vector<128xbf16> to vector<128xf32>
    %39 = vector.shape_cast %38 : vector<128xf32> to vector<1x128xf32>
    %40 = vector.broadcast %39 : vector<1x128xf32> to vector<8x128xf32>
    %41 = arith.addf %37, %40 : vector<8x128xf32>
    %cst_19 = arith.constant dense<0xFF800000> : vector<8xf32>
    %42 = vector.multi_reduction <maximumf>, %41, %cst_19 [1] : vector<8x128xf32> to vector<8xf32>
    %43 = vector.shape_cast %42 : vector<8xf32> to vector<8x1xf32>
    %44 = vector.broadcast %43 : vector<8x1xf32> to vector<8x128xf32>
    %45 = arith.subf %41, %44 : vector<8x128xf32>
    %46 = math.exp %45 : vector<8x128xf32>
    %cst_20 = arith.constant dense<0.000000e+00> : vector<8xf32>
    %47 = vector.multi_reduction <add>, %46, %cst_20 [1] : vector<8x128xf32> to vector<8xf32>
    %48 = vector.shape_cast %47 : vector<8xf32> to vector<8x1xf32>
    %49 = tpu.reciprocal %48 {approx = true} : vector<8x1xf32> -> vector<8x1xf32>
    %50 = vector.broadcast %49 : vector<8x1xf32> to vector<8x128xf32>
    %51 = arith.mulf %46, %50 : vector<8x128xf32>
    %52 = arith.truncf %51 : vector<8x128xf32> to vector<8x128xbf16>
    %cst_21 = arith.constant dense<0.000000e+00> : vector<8x128xf32>
    %53 = tpu.matmul %52, %1, %cst_21 {dimension_numbers = #tpu.dot_dimension_numbers<[1], [0], [0], [1], [0, 0, 1, 1], [], []>} : vector<8x128xbf16>, vector<128x128xbf16>, vector<8x128xf32> -> vector<8x128xf32>
    %54 = arith.addf %21, %53 : vector<8x128xf32>
    %55 = arith.extf %13 : vector<128xbf16> to vector<128xf32>
    %56 = vector.shape_cast %55 : vector<128xf32> to vector<1x128xf32>
    %57 = vector.broadcast %56 : vector<1x128xf32> to vector<8x128xf32>
    %58 = arith.addf %54, %57 : vector<8x128xf32>
    %cst_22 = arith.constant 0.000000e+00 : f32
    %59 = vector.broadcast %cst_22 : f32 to vector<8x128xf32>
    %60 = arith.maximumf %58, %59 : vector<8x128xf32>
    %61 = arith.truncf %60 : vector<8x128xf32> to vector<8x128xbf16>
    %cst_23 = arith.constant dense<0.000000e+00> : vector<8x128xf32>
    %62 = tpu.matmul %61, %4, %cst_23 {dimension_numbers = #tpu.dot_dimension_numbers<[1], [0], [0], [1], [0, 0, 1, 1], [], []>} : vector<8x128xbf16>, vector<128x128xbf16>, vector<8x128xf32> -> vector<8x128xf32>
    %63 = arith.extf %15 : vector<128xbf16> to vector<128xf32>
    %64 = vector.shape_cast %63 : vector<128xf32> to vector<1x128xf32>
    %65 = vector.broadcast %64 : vector<1x128xf32> to vector<8x128xf32>
    %66 = arith.addf %62, %65 : vector<8x128xf32>
    %cst_24 = arith.constant 0.000000e+00 : f32
    %67 = vector.broadcast %cst_24 : f32 to vector<8x128xf32>
    %68 = arith.maximumf %66, %67 : vector<8x128xf32>
    %69 = arith.truncf %68 : vector<8x128xf32> to vector<8x128xbf16>
    %cst_25 = arith.constant dense<0.000000e+00> : vector<8x128xf32>
    %70 = tpu.matmul %69, %5, %cst_25 {dimension_numbers = #tpu.dot_dimension_numbers<[1], [0], [0], [1], [0, 0, 1, 1], [], []>} : vector<8x128xbf16>, vector<128x128xbf16>, vector<8x128xf32> -> vector<8x128xf32>
    %71 = arith.extf %17 : vector<128xbf16> to vector<128xf32>
    %72 = vector.shape_cast %71 : vector<128xf32> to vector<1x128xf32>
    %73 = vector.broadcast %72 : vector<1x128xf32> to vector<8x128xf32>
    %74 = arith.addf %70, %73 : vector<8x128xf32>
    %cst_26 = arith.constant dense<0xFF800000> : vector<8xf32>
    %75 = vector.multi_reduction <maximumf>, %74, %cst_26 [1] : vector<8x128xf32> to vector<8xf32>
    %76 = vector.shape_cast %75 : vector<8xf32> to vector<8x1xf32>
    %77 = vector.broadcast %76 : vector<8x1xf32> to vector<8x128xf32>
    %78 = arith.subf %74, %77 : vector<8x128xf32>
    %79 = math.exp %78 : vector<8x128xf32>
    %cst_27 = arith.constant dense<0.000000e+00> : vector<8xf32>
    %80 = vector.multi_reduction <add>, %79, %cst_27 [1] : vector<8x128xf32> to vector<8xf32>
    %81 = vector.shape_cast %80 : vector<8xf32> to vector<8x1xf32>
    %82 = tpu.reciprocal %81 {approx = true} : vector<8x1xf32> -> vector<8x1xf32>
    %83 = vector.broadcast %82 : vector<8x1xf32> to vector<8x128xf32>
    %84 = arith.mulf %79, %83 : vector<8x128xf32>
    %85 = arith.addf %51, %84 : vector<8x128xf32>
    %86 = arith.truncf %85 : vector<8x128xf32> to vector<8x128xbf16>
    %c0_28 = arith.constant 0 : index
    %c0_29 = arith.constant 0 : index
    %87 = vector.load %arg4[%c0_28, %c0_29] : memref<8x128xbf16, #tpu.memory_space<vmem>>, vector<8x128xbf16>
    tpu.vector_store %arg4[%c0_28, %c0_29], %86 {strides = array<i32>} : memref<8x128xbf16, #tpu.memory_space<vmem>>, vector<8x128xbf16>,
    return
  }
  func.func @transform_0(%arg0: i32) -> (i32, i32) {
    %c0_i32 = arith.constant 0 : i32
    %c0_i32_0 = arith.constant 0 : i32
    return %arg0, %c0_i32 : i32, i32
  }
  func.func @transform_1(%arg0: i32) -> (i32, i32) {
    %c0_i32 = arith.constant 0 : i32
    %c0_i32_0 = arith.constant 0 : i32
    %c0_i32_1 = arith.constant 0 : i32
    return %c0_i32, %c0_i32_0 : i32, i32
  }
  func.func @transform_2(%arg0: i32) -> (i32, i32) {
    %c0_i32 = arith.constant 0 : i32
    %c0_i32_0 = arith.constant 0 : i32
    %c0_i32_1 = arith.constant 0 : i32
    return %c0_i32, %c0_i32_0 : i32, i32
  }
  func.func @transform_3(%arg0: i32) -> (i32, i32) {
    %c0_i32 = arith.constant 0 : i32
    %c0_i32_0 = arith.constant 0 : i32
    return %arg0, %c0_i32 : i32, i32
  }
}

</mosaic_0001>

<bundles_post_ra>
// kernel: tpu_custom_call.1
= control target key start
LH: loop header
LB: loop body
LE: loop exit
PB: predicated region body
PF: predicated region fallthrough
CT: control target
= control target key end

     0   :  { %8 = vsyncpa [#allocation3], 0  ;;  %s1208_s0 = inlined_call_operand.hbm [shape: bf16[8,16], index: 0, kind: input, shape index: {}]   ;;  %s1209_s1 = inlined_call_operand.hbm [shape: bf16[16,256], index: 1, kind: input, shape index: {}]   ;;  %s1210_s2 = inlined_call_operand.hbm [shape: bf16[656,128], index: 2, kind: input, shape index: {}]   ;;  %s1211_s3 = inlined_call_operand.hbm [shape: bf16[8,128], index: 3, kind: output, shape index: {}]  }
   0x1   :  { %9 = vsyncpa [#allocation6], 0 }
   0x2   :  { %10 = vsyncpa [#allocation4], 0  ;;  %s1056_s12 = smov [#allocation5]   ;;  %s962_s16 = scalar_lea.hbm %s1209_s1, 256 }
   0x3   :  { %s26_s13 = sshll.u32 %s1056_s12, 4  ;;  %p963_p0 = scmp.ne.s32.totalorder %s1209_s1, %s962_s16  ;;  %s27_s13 = int_to_ptr.vmem [resolvable:$true] %s26_s13 }
   0x4   :  { %p966_p1 = scmp.lt.u32.totalorder %s962_s16, %s1209_s1 }
   0x6   :  { %p968_p2 = pnand %p966_p1, %p963_p0 }
   0x8   :  { %971 = shalt.err (!%p968_p2)
}
   0x9   :  { %s972_s21 = scalar_lea.vmem %s27_s13, 256  ;;  %p977_p4 = scmp.lt.s32.totalorder %s27_s13, %s27_s13 }
   0xa   :  { %p973_p3 = scmp.ne.s32.totalorder %s27_s13, %s972_s21  ;;  %p978_p5 = scmp.lt.s32.totalorder %s972_s21, %s972_s21 }
   0xc   :  { %p979_p6 = por %p978_p5, %p977_p4 }
   0xe   :  { %p980_p7 = pnand %p979_p6, %p973_p3 }
  0x10   :  { %983 = shalt.err (!%p980_p7)
}
  0x11   :  { %s1057_s22 = smov 128   ;;  %s1058_s23 = smov 8  }
  0x12   :  { %32 = dma.hbm_to_vmem [thread:$0]  %s1209_s1, 256, %s27_s13, [#allocation6], %s1057_s22, %s1057_s22, %s1058_s23  }
  0x13   :  { %s1059_s26 = smov [#allocation2]   ;;  %s1060_s28 = smov [#allocation7]  }
  0x14   :  { %s17_s27 = sshll.u32 %s1059_s26, 4  ;;  %s38_s29 = sshll.u32 %s1060_s28, 4  ;;  %s18_s27 = int_to_ptr.vmem [resolvable:$true] %s17_s27  ;;  %s39_s29 = int_to_ptr.vmem [resolvable:$true] %s38_s29 }
  0x15   :  { %s984_s5 = scalar_lea.hbm %s1208_s0, 64 }
  0x16   :  { %p985_p8 = scmp.ne.s32.totalorder %s1208_s0, %s984_s5  ;;  %p988_p9 = scmp.lt.u32.totalorder %s984_s5, %s1208_s0 }
  0x18   :  { %p990_p10 = pnand %p988_p9, %p985_p8 }
  0x1a   :  { %993 = shalt.err (!%p990_p10)
}
  0x1b   :  { %s994_s1 = scalar_lea.vmem %s18_s27, 64  ;;  %p999_p12 = scmp.lt.s32.totalorder %s18_s27, %s18_s27 }
  0x1c   :  { %p995_p11 = scmp.ne.s32.totalorder %s18_s27, %s994_s1  ;;  %p1000_p13 = scmp.lt.s32.totalorder %s994_s1, %s994_s1 }
  0x1e   :  { %p1001_p0 = por %p1000_p13, %p999_p12 }
  0x20   :  { %p1002_p1 = pnand %p1001_p0, %p995_p11 }
  0x22   :  { %1005 = shalt.err (!%p1002_p1)
}
  0x23   :  { %20 = dma.hbm_to_vmem [thread:$0]  %s1208_s0, 64, %s18_s27, [#allocation3]  }
  0x24   :  { %s1006_s14 = scalar_lea.hbm %s1210_s2, 5248 }
  0x25   :  { %p1007_p2 = scmp.ne.s32.totalorder %s1210_s2, %s1006_s14  ;;  %p1010_p3 = scmp.lt.u32.totalorder %s1006_s14, %s1210_s2 }
  0x27   :  { %p1012_p4 = pnand %p1010_p3, %p1007_p2 }
  0x29   :  { %1015 = shalt.err (!%p1012_p4)
}
  0x2a   :  { %s1016_s19 = scalar_lea.vmem %s39_s29, 5248  ;;  %p1021_p6 = scmp.lt.s32.totalorder %s39_s29, %s39_s29 }
  0x2b   :  { %p1017_p5 = scmp.ne.s32.totalorder %s39_s29, %s1016_s19  ;;  %p1022_p7 = scmp.lt.s32.totalorder %s1016_s19, %s1016_s19 }
  0x2d   :  { %p1023_p8 = por %p1022_p7, %p1021_p6 }
  0x2f   :  { %p1024_p9 = pnand %p1023_p8, %p1017_p5 }
  0x31   :  { %1027 = shalt.err (!%p1024_p9)
}
  0x32   :  { %s1061_s0 = smov 64   ;;  %s1062_s20 = smov 4  }
  0x33   :  { %44 = dma.hbm_to_vmem [thread:$0]  %s1210_s2, 5248, %s39_s29, [#allocation6], %s1061_s0, %s1061_s0, %s1062_s20  }
  0x34   :  { %1050 = dma.done.wait [#allocation3], 64  }
  0x35   :  { %1051 = vsyncadd [#allocation3], 4294967232 }
  0x36   :  { %1052 = dma.done.wait [#allocation6], 5504  }
  0x37   :  { %1053 = vsyncadd [#allocation6], 4294961792  ;;  %v1063_v0 = vmov 0   ;;  %v1064_v1 = vmov 0.0   ;;  %v911_v2 = vld [vmem:[#allocation5 + $0x4] ss:$8 sps:$4 sm:$0xff]   ;;  %v197_v19 = vlaneseq }
  0x38   :  { %187 = vmatprep.mubr.bf16.mxu0 %v1063_v0  ;;  %800 = vmatprep.subr.bf16.mxu1 %v1064_v1  ;;  %v913_v3 = vld [vmem:[#allocation5] ss:$8 sps:$4 sm:$0xff]   ;;  %vm151_vm0 = vcmask 130048   ;;  %v914_v4 = vld [vmem:[#allocation7 + $0x40] sm:$0xff]   ;;  %v55_v5 = vld [vmem:[#allocation2] sm:$0xf] }
  0x39   :  { %155 = vmatprep.subr.bf16.mxu0 %v911_v2  ;;  %801 = vmatpush3.bf16.msra.mxu1 %v914_v4  ;;  %v915_v6 = vld [vmem:[#allocation7 + $0x48] sm:$0xff]   ;;  %v916_v7 = vld [vmem:[#allocation7 + $0x50] sm:$0xff]   ;;  %v917_v8 = vld [vmem:[#allocation7 + $0x58] sm:$0xff]   ;;  %vm1065_vm1 = vmmov 0   ;;  %v1143_v20 = vshrl.u32 %v197_v19, 7  ;;  %s1066_s2 = smov [#allocation8]  }
  0x3a   :  { %156 = vmatpush1.bf16.msra.mxu0 %v913_v3  ;;  %802 = vmatprep.subr.bf16.mxu1 %v1064_v1  ;;  %v918_v9 = vld [vmem:[#allocation7 + $0x60] sm:$0xff]   ;;  %v919_v10 = vld [vmem:[#allocation7 + $0x68] sm:$0xff]   ;;  %v920_v11 = vld [vmem:[#allocation7 + $0x70] sm:$0xff]   ;;  %s702_s23 = sshll.u32 %s1066_s2, 4  ;;  %s703_s23 = int_to_ptr.vmem [resolvable:$true] %s702_s23 }
  0x3b   :  { %820 = vmatprep.subr.bf16.mxu0 %v1064_v1  ;;  %v921_v12 = vld [vmem:[#allocation7 + $0x78] sm:$0xff]   ;;  %816 = vmatprep.mubr.msk.bf16.mxu1 %vm1065_vm1, %v1064_v1  ;;  %v922_v13 = vld [vmem:[#allocation7 + $0x80] sm:$0xff]   ;;  %v923_v14 = vld [vmem:[#allocation7 + $0x88] sm:$0xff]   ;;  %v199_v23 = vsub.s32 0, %v1143_v20  ;;  %v206_v34 = vsub.s32 1, %v1143_v20  ;;  %v301_v45 = vsub.s32 2, %v1143_v20  ;;  %p1033_p11 = scmp.lt.s32.totalorder %s703_s23, %s703_s23 }
  0x3c   :  { %v924_v15 = vld [vmem:[#allocation7 + $0x90] sm:$0xff]   ;;  %v925_v16 = vld [vmem:[#allocation7 + $0x98] sm:$0xff]   ;;  %v926_v17 = vld [vmem:[#allocation7 + $0xa0] sm:$0xff]   ;;  %v492_v19 = vsub.s32 3, %v1143_v20  ;;  %s1028_s24 = scalar_lea.vmem %s703_s23, 64 }
  0x3d   :  { %714 = vmatmul.mubr.msk.bf16.vlgmr.msra.gmra.mrb[0].mxu0 %vm151_vm0, %v55_v5  ;;  %803 = vmatpush3.bf16.msra.mxu1 %v915_v6  ;;  %v927_v18 = vld [vmem:[#allocation7 + $0xa8] sm:$0xff]   ;;  %v136_v21 = vld [vmem:[#allocation7 + $0x140] sm:$0x1]  ;;  %v928_v32 = vld [vmem:[#allocation7 + $0xb0] sm:$0xff]   ;;  %p1029_p10 = scmp.ne.s32.totalorder %s703_s23, %s1028_s24  ;;  %p1034_p12 = scmp.lt.s32.totalorder %s1028_s24, %s1028_s24 }
  0x3e   :  { %804 = vmatprep.subr.bf16.mxu1 %v1064_v1  ;;  %836 = vmatprep.mubr.msk.bf16.mxu0 %vm1065_vm1, %v1064_v1  ;;  %v196_v22 = vunpack.c.l.bf16 %v136_v21  ;;  %v929_v33 = vld [vmem:[#allocation7 + $0xb8] sm:$0xff]   ;;  %v1155_v43 = vld [vmem:[#allocation7 + $0x140] sm:$0x2]  ;;  %v931_v53 = vld [vmem:[#allocation7 + $0x8] sm:$0xff]  }
  0x3f   :  { %821 = vmatpush3.bf16.msra.mxu0 %v922_v13  ;;  %v298_v44 = vunpack.c.l.bf16 %v1155_v43  ;;  %v930_v52 = vld [vmem:[#allocation7] sm:$0xff]   ;;  %v932_v54 = vld [vmem:[#allocation7 + $0x10] sm:$0xff]   ;;  %v933_v55 = vld [vmem:[#allocation7 + $0x18] sm:$0xff]   ;;  %v594_v43 = vsub.s32 5, %v1143_v20  ;;  %p1035_p13 = por %p1034_p12, %p1033_p11 }
  0x40   :  { %822 = vmatprep.subr.bf16.mxu0 %v1064_v1  ;;  %v200_v24 = vrot.slane %v196_v22, %v199_v23  ;;  %v207_v35 = vrot.slane %v196_v22, %v206_v34  ;;  %v934_v60 = vld [vmem:[#allocation7 + $0x20] sm:$0xff]   ;;  %v935_v61 = vld [vmem:[#allocation7 + $0x28] sm:$0xff]   ;;  %v936_v62 = vld [vmem:[#allocation7 + $0x30] sm:$0xff]  }
  0x41   :  { %805 = vmatpush3.bf16.msra.mxu1 %v916_v7  ;;  %v302_v46 = vrot.slane %v298_v44, %v301_v45  ;;  %v937_v63 = vld [vmem:[#allocation7 + $0x38] sm:$0xff]   ;;  %v938_v0 = vld [vmem:[#allocation7 + $0xc0] sm:$0xff]   ;;  %v939_v2 = vld [vmem:[#allocation7 + $0xc8] sm:$0xff]   ;;  %v493_v21 = vrot.slane %v298_v44, %v492_v19  ;;  %p1036_p0 = pnand %p1035_p13, %p1029_p10 }
  0x42   :  { %806 = vmatprep.subr.bf16.mxu1 %v1064_v1  ;;  %v940_v3 = vld [vmem:[#allocation7 + $0xd0] sm:$0xff]   ;;  %v941_v4 = vld [vmem:[#allocation7 + $0xd8] sm:$0xff]   ;;  %v942_v5 = vld [vmem:[#allocation7 + $0xe0] sm:$0xff]  }
  0x43   :  { %823 = vmatpush3.bf16.msra.mxu0 %v923_v14  ;;  %v943_v6 = vld [vmem:[#allocation7 + $0xe8] sm:$0xff]   ;;  %v946_v13 = vld [vmem:[#allocation7 + $0x100] sm:$0xff]  }
  0x44   :  { %824 = vmatprep.subr.bf16.mxu0 %v1064_v1  ;;  %v947_v14 = vld [vmem:[#allocation7 + $0x108] sm:$0xff]  }
  0x45   :  { %807 = vmatpush3.bf16.msra.mxu1 %v917_v8 }
  0x46   :  { %808 = vmatprep.subr.bf16.mxu1 %v1064_v1 }
  0x47   :  { %825 = vmatpush3.bf16.msra.mxu0 %v924_v15  ;;  %v948_v15 = vld [vmem:[#allocation7 + $0x110] sm:$0xff]  }
  0x48   :  { %826 = vmatprep.subr.bf16.mxu0 %v1064_v1 }
  0x49   :  { %809 = vmatpush3.bf16.msra.mxu1 %v918_v9 }
  0x4a   :  { %810 = vmatprep.subr.bf16.mxu1 %v1064_v1 }
  0x4b   :  { %827 = vmatpush3.bf16.msra.mxu0 %v925_v16  ;;  %v949_v16 = vld [vmem:[#allocation7 + $0x118] sm:$0xff]  }
  0x4c   :  { %828 = vmatprep.subr.bf16.mxu0 %v1064_v1 }
  0x4d   :  { %811 = vmatpush3.bf16.msra.mxu1 %v919_v10 }
  0x4e   :  { %812 = vmatprep.subr.bf16.mxu1 %v1064_v1 }
  0x4f   :  { %829 = vmatpush3.bf16.msra.mxu0 %v926_v17  ;;  %v950_v17 = vld [vmem:[#allocation7 + $0x120] sm:$0xff]  }
  0x50   :  { %830 = vmatprep.subr.bf16.mxu0 %v1064_v1 }
  0x51   :  { %813 = vmatpush3.bf16.msra.mxu1 %v920_v11  ;;  %v944_v11 = vld [vmem:[#allocation7 + $0xf0] sm:$0xff]  }
  0x52   :  { %814 = vmatprep.subr.bf16.mxu1 %v1064_v1 }
  0x53   :  { %831 = vmatpush3.bf16.msra.mxu0 %v927_v18  ;;  %v951_v18 = vld [vmem:[#allocation7 + $0x128] sm:$0xff]  }
  0x54   :  { %832 = vmatprep.subr.bf16.mxu0 %v1064_v1 }
  0x55   :  { %815 = vmatpush3.bf16.msra.mxu1 %v921_v12  ;;  %v945_v12 = vld [vmem:[#allocation7 + $0xf8] sm:$0xff]  }
  0x56   :  { %840 = vmatprep.subr.bf16.mxu1 %v1064_v1 }
  0x57   :  { %833 = vmatpush3.bf16.msra.mxu0 %v928_v32  ;;  %v953_v32 = vld [vmem:[#allocation7 + $0x138] sm:$0xff]  }
  0x58   :  { %834 = vmatprep.subr.bf16.mxu0 %v1064_v1 }
  0x5b   :  { %835 = vmatpush3.bf16.msra.mxu0 %v929_v33  ;;  %v138_v33 = vld [vmem:[#allocation7 + $0x140] sm:$0x4] }
  0x5c   :  { %860 = vmatprep.subr.bf16.mxu0 %v1064_v1  ;;  %v497_v34 = vunpack.c.l.bf16 %v138_v33 }
  0x5e   :  { %v595_v44 = vrot.slane %v497_v34, %v594_v43 }
 0x110   :  { %v189_v25 = vpop.f32.mrb[0].mxu0 }
 0x111   :  { %v201_v26 = vadd.f32 %v200_v24, %v189_v25  ;;  %v1146_v27 = vpop.f32.mrb[1].mxu0 }
 0x112   :  { %v193_v28 = vpop.f32.mrb[2].mxu0 }
 0x113   :  { %v202_v29 = vmax.f32 %v201_v26, 0.0  ;;  %v194_v30 = vpop.f32.mrb[3].mxu0 }
 0x115   :  { %v203_v31 = vpack.c.bf16 %v202_v29, %v202_v29 }
 0x117   :  { %817 = vmatmul.mubr.bf16.vlgmr.msra.gmra.mrb[0].mxu1 %v203_v31  ;;  %v952_v31 = vld [vmem:[#allocation7 + $0x130] sm:$0xff]  }
 0x118   :  { %856 = vmatprep.mubr.msk.bf16.mxu1 %vm1065_vm1, %v1064_v1  ;;  %841 = vmatpush3.bf16.msra.mxu1 %v930_v52 }
 0x119   :  { %842 = vmatprep.subr.bf16.mxu1 %v1064_v1 }
 0x11c   :  { %843 = vmatpush3.bf16.msra.mxu1 %v931_v53 }
 0x11d   :  { %844 = vmatprep.subr.bf16.mxu1 %v1064_v1 }
 0x120   :  { %845 = vmatpush3.bf16.msra.mxu1 %v932_v54 }
 0x121   :  { %846 = vmatprep.subr.bf16.mxu1 %v1064_v1 }
 0x124   :  { %847 = vmatpush3.bf16.msra.mxu1 %v933_v55 }
 0x125   :  { %848 = vmatprep.subr.bf16.mxu1 %v1064_v1 }
 0x128   :  { %849 = vmatpush3.bf16.msra.mxu1 %v934_v60 }
 0x129   :  { %850 = vmatprep.subr.bf16.mxu1 %v1064_v1 }
 0x12c   :  { %851 = vmatpush3.bf16.msra.mxu1 %v935_v61 }
 0x12d   :  { %852 = vmatprep.subr.bf16.mxu1 %v1064_v1 }
 0x130   :  { %853 = vmatpush3.bf16.msra.mxu1 %v936_v62 }
 0x131   :  { %854 = vmatprep.subr.bf16.mxu1 %v1064_v1 }
 0x134   :  { %855 = vmatpush3.bf16.msra.mxu1 %v937_v63 }
 0x135   :  { %880 = vmatprep.subr.bf16.mxu1 %v1064_v1 }
 0x1ea   :  { %v290_v36 = vpop.f32.mrb[0].mxu1 }
 0x1eb   :  { %v291_v37 = vadd.f32 %v290_v36, %v207_v35  ;;  %v818_v38 = vpop.f32.mrb[1].mxu1  ;;  %v500_v35 = vsub.s32 4, %v1143_v20 }
 0x1ec   :  { %v293_v39 = vpop.f32.mrb[2].mxu1 }
 0x1ed   :  { %v296_v40 = vmax.f32 %v291_v37, 0.0  ;;  %v819_v41 = vpop.f32.mrb[3].mxu1  ;;  %v501_v36 = vrot.slane %v497_v34, %v500_v35 }
 0x1ef   :  { %v297_v42 = vpack.c.bf16 %v296_v40, %v296_v40 }
 0x1f1   :  { %837 = vmatmul.mubr.bf16.vlgmr.msra.gmra.mrb[4].mxu0 %v297_v42 }
 0x1f2   :  { %876 = vmatprep.mubr.msk.bf16.mxu0 %vm1065_vm1, %v1064_v1  ;;  %861 = vmatpush3.bf16.msra.mxu0 %v938_v0 }
 0x1f3   :  { %862 = vmatprep.subr.bf16.mxu0 %v1064_v1 }
 0x1f6   :  { %863 = vmatpush3.bf16.msra.mxu0 %v939_v2 }
 0x1f7   :  { %864 = vmatprep.subr.bf16.mxu0 %v1064_v1 }
 0x1fa   :  { %865 = vmatpush3.bf16.msra.mxu0 %v940_v3 }
 0x1fb   :  { %866 = vmatprep.subr.bf16.mxu0 %v1064_v1 }
 0x1fe   :  { %867 = vmatpush3.bf16.msra.mxu0 %v941_v4 }
 0x1ff   :  { %868 = vmatprep.subr.bf16.mxu0 %v1064_v1 }
 0x202   :  { %869 = vmatpush3.bf16.msra.mxu0 %v942_v5 }
 0x203   :  { %870 = vmatprep.subr.bf16.mxu0 %v1064_v1 }
 0x206   :  { %871 = vmatpush3.bf16.msra.mxu0 %v943_v6 }
 0x207   :  { %872 = vmatprep.subr.bf16.mxu0 %v1064_v1 }
 0x20a   :  { %873 = vmatpush3.bf16.msra.mxu0 %v944_v11 }
 0x20b   :  { %874 = vmatprep.subr.bf16.mxu0 %v1064_v1 }
 0x20e   :  { %875 = vmatpush3.bf16.msra.mxu0 %v945_v12 }
 0x2c4   :  { %v385_v47 = vpop.f32.mrb[4].mxu0 }
 0x2c5   :  { %v386_v48 = vadd.f32 %v385_v47, %v302_v46  ;;  %v838_v49 = vpop.f32.mrb[5].mxu0 }
 0x2c6   :  { %v388_v50 = vpop.f32.mrb[6].mxu0 }
 0x2c7   :  { %391 = vmax.xlane.f32.xlu0 %v386_v48  ;;  %v839_v51 = vpop.f32.mrb[7].mxu0 }
 0x354   :  { %v392_v56 = vpop.xlane.xlu0 %391 }
 0x355   :  { %v393_v57 = vsub.f32 %v386_v48, %v392_v56 }
 0x357   :  { %v394_v58 = vmul.f32 1.442695, %v393_v57 }
 0x359   :  { %954 = vpow2.f32 %v394_v58 }
 0x363   :  { %v955_v59 = vpop.eup %954 }
 0x364   :  { %396 = vadd.xlane.f32.xlu0 %v955_v59 }
 0x3f1   :  { %v397_v7 = vpop.xlane.xlu0 %396 }
 0x3f2   :  { %956 = vrcp.f32 %v397_v7 }
 0x3fc   :  { %v957_v8 = vpop.eup %956 }
 0x3fd   :  { %v1175_v9 = vmul.f32 %v957_v8, %v955_v59 }
 0x3ff   :  { %v400_v10 = vpack.c.bf16 %v1175_v9, %v1175_v9 }
 0x401   :  { %857 = vmatmul.mubr.bf16.vlgmr.msra.gmra.mrb[4].mxu1 %v400_v10 }
 0x402   :  { %896 = vmatprep.mubr.msk.bf16.mxu1 %vm1065_vm1, %v1064_v1  ;;  %881 = vmatpush3.bf16.msra.mxu1 %v946_v13 }
 0x403   :  { %882 = vmatprep.subr.bf16.mxu1 %v1064_v1 }
 0x406   :  { %883 = vmatpush3.bf16.msra.mxu1 %v947_v14 }
 0x407   :  { %884 = vmatprep.subr.bf16.mxu1 %v1064_v1 }
 0x40a   :  { %885 = vmatpush3.bf16.msra.mxu1 %v948_v15 }
 0x40b   :  { %886 = vmatprep.subr.bf16.mxu1 %v1064_v1 }
 0x40e   :  { %887 = vmatpush3.bf16.msra.mxu1 %v949_v16 }
 0x40f   :  { %888 = vmatprep.subr.bf16.mxu1 %v1064_v1 }
 0x412   :  { %889 = vmatpush3.bf16.msra.mxu1 %v950_v17 }
 0x413   :  { %890 = vmatprep.subr.bf16.mxu1 %v1064_v1 }
 0x416   :  { %891 = vmatpush3.bf16.msra.mxu1 %v951_v18 }
 0x417   :  { %892 = vmatprep.subr.bf16.mxu1 %v1064_v1 }
 0x41a   :  { %893 = vmatpush3.bf16.msra.mxu1 %v952_v31 }
 0x41b   :  { %894 = vmatprep.subr.bf16.mxu1 %v1064_v1 }
 0x41e   :  { %895 = vmatpush3.bf16.msra.mxu1 %v953_v32 }
 0x4d4   :  { %v483_v22 = vpop.f32.mrb[4].mxu1 }
 0x4d5   :  { %v489_v23 = vadd.f32 %v483_v22, %v1146_v27  ;;  %v858_v24 = vpop.f32.mrb[5].mxu1 }
 0x4d6   :  { %v486_v25 = vpop.f32.mrb[6].mxu1 }
 0x4d7   :  { %v494_v26 = vadd.f32 %v493_v21, %v489_v23  ;;  %v859_v28 = vpop.f32.mrb[7].mxu1 }
 0x4d9   :  { %v495_v29 = vmax.f32 %v494_v26, 0.0 }
 0x4db   :  { %v496_v30 = vpack.c.bf16 %v495_v29, %v495_v29 }
 0x4dd   :  { %877 = vmatmul.mubr.bf16.vlgmr.msra.gmra.mrb[8].mxu0 %v496_v30 }
 0x5b0   :  { %v584_v37 = vpop.f32.mrb[8].mxu0 }
 0x5b1   :  { %v585_v27 = vadd.f32 %v584_v37, %v501_v36  ;;  %v878_v38 = vpop.f32.mrb[9].mxu0 }
 0x5b2   :  { %v587_v39 = vpop.f32.mrb[10].mxu0 }
 0x5b3   :  { %v590_v40 = vmax.f32 %v585_v27, 0.0  ;;  %v879_v41 = vpop.f32.mrb[11].mxu0 }
 0x5b5   :  { %v591_v42 = vpack.c.bf16 %v590_v40, %v590_v40 }
 0x5b7   :  { %897 = vmatmul.mubr.bf16.vlgmr.msra.gmra.mrb[8].mxu1 %v591_v42 }
 0x68a   :  { %v678_v45 = vpop.f32.mrb[8].mxu1 }
 0x68b   :  { %v679_v1 = vadd.f32 %v678_v45, %v595_v44  ;;  %v898_v46 = vpop.f32.mrb[9].mxu1 }
 0x68c   :  { %v681_v47 = vpop.f32.mrb[10].mxu1 }
 0x68d   :  { %684 = vmax.xlane.f32.xlu1 %v679_v1  ;;  %v899_v48 = vpop.f32.mrb[11].mxu1 }
 0x71a   :  { %v685_v49 = vpop.xlane.xlu1 %684 }
 0x71b   :  { %v686_v50 = vsub.f32 %v679_v1, %v685_v49 }
 0x71d   :  { %v687_v51 = vmul.f32 1.442695, %v686_v50 }
 0x71f   :  { %958 = vpow2.f32 %v687_v51 }
 0x729   :  { %v959_v52 = vpop.eup %958 }
 0x72a   :  { %689 = vadd.xlane.f32.xlu1 %v959_v52 }
 0x7b7   :  { %v690_v53 = vpop.xlane.xlu1 %689 }
 0x7b8   :  { %960 = vrcp.f32 %v690_v53 }
 0x7c2   :  { %v961_v54 = vpop.eup %960 }
 0x7c3   :  { %v692_v55 = vmul.f32 %v961_v54, %v959_v52 }
 0x7c5   :  { %v693_v20 = vadd.f32 %v692_v55, %v1175_v9 }
 0x7c7   :  { %v694_v56 = vpack.c.bf16 %v693_v20, %v693_v20 }
 0x7c9   :  { %695 = vst [vmem:[#allocation8] sm:$0xf] %v694_v56 }
 0x7ca   :  { %1039 = shalt.err (!%p1036_p0)
}
 0x7cb   :  { %s1040_s27 = scalar_lea.hbm %s1211_s3, 64 }
 0x7cc   :  { %p1041_p1 = scmp.ne.s32.totalorder %s1211_s3, %s1040_s27  ;;  %p1044_p2 = scmp.lt.u32.totalorder %s1040_s27, %s1211_s3 }
 0x7ce   :  { %p1046_p3 = pnand %p1044_p2, %p1041_p1 }
 0x7d0   :  { %1049 = shalt.err (!%p1046_p3)
}
 0x7d1   :  { %705 = dma.vmem_to_hbm [thread:$0]  %s703_s23, 64, %s1211_s3, [#allocation4]  }
 0x7d2   :  { %1054 = dma.done.wait [#allocation4], 64  }
 0x7d3   :  { %1055 = vsyncadd [#allocation4], 4294967232 }
 0x7d4   :  { %709 = vsyncpa [#allocation3], 1 }
 0x7d5   :  { %710 = vsyncpa [#allocation6], 1 }
 0x7d6   :  { %711 = vsyncpa [#allocation4], 1 }

</bundles_post_ra>
